<compile_context>
chip_gen: v6e
topology: v6e:2x2x1
jax: 0.10.0
libtpu: 0.0.40
codegen_flags: <defaults>
</compile_context>

<pallas_src>
import functools

import jax
import jax.numpy as jnp
from jax import lax
from jax.experimental import pallas as pl
from jax.experimental.pallas import tpu as pltpu  # noqa: F401  (TPU backend import)


def make_one_hot_kernel(x_ref, o_ref, *, num_classes):
    # x_ref: (R, Ncols) view of the flattened input; last dim on the lane axis.
    x = x_ref[...].astype(jnp.float32)
    R, Ncols = x.shape

    # Global max over the whole block (VPU compare + XLU cross-lane reduce).
    x_max = jnp.max(x)

    # Row-major flat index of the first occurrence of the max — matches
    # torch.argmax on the flattened tensor (first index wins on ties).
    row_idx = lax.broadcasted_iota(jnp.int32, (R, Ncols), 0)
    col_idx = lax.broadcasted_iota(jnp.int32, (R, Ncols), 1)
    flat_idx = row_idx * Ncols + col_idx
    sentinel = jnp.int32(R * Ncols)
    ind = jnp.min(jnp.where(x == x_max, flat_idx, sentinel))

    # One-hot along the lane axis: single vectorized compare, lane-dense store.
    classes = lax.broadcasted_iota(jnp.int32, (1, num_classes), 1)
    o_ref[...] = (classes == ind).astype(o_ref.dtype)


def make_one_hot(x, num_classes):
    """x: any-shape float array. Returns (num_classes,) int32 one-hot of the global argmax."""
    # Flatten to 2-D keeping the original last dim on the lane axis so the
    # row-major flat index matches torch.argmax(x) on the flattened tensor.
    if x.ndim == 0:
        x2 = x.reshape(1, 1)
    elif x.ndim == 1:
        x2 = x.reshape(1, x.shape[0])
    else:
        x2 = x.reshape(-1, x.shape[-1])
    R, Ncols = x2.shape

    kernel = functools.partial(make_one_hot_kernel, num_classes=num_classes)
    out = pl.pallas_call(
        kernel,
        out_shape=jax.ShapeDtypeStruct((1, num_classes), jnp.int32),
        grid=(1,),
        in_specs=[pl.BlockSpec((R, Ncols), lambda i: (0, 0))],
        out_specs=pl.BlockSpec((1, num_classes), lambda i: (0, 0)),
    )(x2)
    # TODO(synk): torch F.one_hot returns int64; JAX x64 is off, so int32 here.
    return out[0]


if __name__ == "__main__":
    key = jax.random.PRNGKey(0)
    k1, k2 = jax.random.split(key, 2)

    # Case 1: the natural use — a logits vector of length num_classes.
    num_classes = 8
    x = jax.random.normal(k1, (num_classes,), dtype=jnp.float32)
    y = jax.block_until_ready(make_one_hot(x, num_classes))
    ind_ref = jnp.argmax(x)
    y_ref = (jnp.arange(num_classes) == ind_ref).astype(jnp.int32)
    assert y.shape == (num_classes,)
    assert int(jnp.sum(y)) == 1
    assert bool(jnp.all(y == y_ref)), f"mismatch: {y} vs {y_ref}"

    # Case 2: multi-dim input — argmax over the flattened tensor.
    num_classes2 = 16
    x2 = jax.random.normal(k2, (2, 8), dtype=jnp.float32)
    y2 = jax.block_until_ready(make_one_hot(x2, num_classes2))
    ind_ref2 = jnp.argmax(x2)  # flattened argmax, like torch.argmax
    y_ref2 = (jnp.arange(num_classes2) == ind_ref2).astype(jnp.int32)
    assert y2.shape == (num_classes2,)
    assert int(jnp.sum(y2)) == 1
    assert bool(jnp.all(y2 == y_ref2)), f"mismatch: {y2} vs {y_ref2}"

    print("KERNEL_OK")
</pallas_src>

<mosaic_0001>
module attributes {stable_mosaic.version = 11 : i64} {
  func.func @make_one_hot_kernel(%arg0: i32, %arg1: memref<1x8xf32, #tpu.memory_space<vmem>>, %arg2: memref<1x8xi32, #tpu.memory_space<vmem>>) attributes {dimension_semantics = [#tpu.dimension_semantics<arbitrary>], iteration_bounds = array<i64: 1>, scalar_prefetch = 0 : i64, scratch_operands = 0 : i64, tpu.core_type = #tpu.core_type<tc>, window_params = [{pipeline_mode = #tpu.pipeline_mode<synchronous>, transform_indices = @transform_0, window_bounds = array<i64: 1, 8>}, {pipeline_mode = #tpu.pipeline_mode<synchronous>, transform_indices = @transform_1, window_bounds = array<i64: 1, 8>}]} {
    %c0 = arith.constant 0 : index
    %c0_0 = arith.constant 0 : index
    %0 = vector.load %arg1[%c0, %c0_0] : memref<1x8xf32, #tpu.memory_space<vmem>>, vector<1x8xf32>
    %1 = vector.shape_cast %0 : vector<1x8xf32> to vector<1x1x8xf32>
    %cst = arith.constant dense<0xFF800000> : vector<1xf32>
    %2 = vector.multi_reduction <maximumf>, %1, %cst [1, 2] : vector<1x1x8xf32> to vector<1xf32>
    %3 = vector.shape_cast %2 : vector<1xf32> to vector<1x1x1xf32>
    %4 = vector.extract %3[0, 0, 0] : f32 from vector<1x1x1xf32>
    %5 = tpu.iota {dimensions = array<i32: 0>} : vector<1x8xi32>
    %6 = tpu.iota {dimensions = array<i32: 1>} : vector<1x8xi32>
    %c8_i32 = arith.constant 8 : i32
    %7 = vector.broadcast %c8_i32 : i32 to vector<1x8xi32>
    %8 = arith.muli %5, %7 : vector<1x8xi32>
    %9 = arith.addi %8, %6 : vector<1x8xi32>
    %10 = vector.broadcast %4 : f32 to vector<1x8xf32>
    %11 = arith.cmpf oeq, %0, %10 : vector<1x8xf32>
    %c8_i32_1 = arith.constant 8 : i32
    %12 = vector.broadcast %c8_i32_1 : i32 to vector<1x8xi32>
    %13 = arith.select %11, %9, %12 : vector<1x8xi1>, vector<1x8xi32>
    %14 = vector.shape_cast %13 : vector<1x8xi32> to vector<1x1x8xi32>
    %cst_2 = arith.constant dense<2147483647> : vector<1xi32>
    %15 = vector.multi_reduction <minsi>, %14, %cst_2 [1, 2] : vector<1x1x8xi32> to vector<1xi32>
    %16 = vector.shape_cast %15 : vector<1xi32> to vector<1x1x1xi32>
    %17 = vector.extract %16[0, 0, 0] : i32 from vector<1x1x1xi32>
    %18 = tpu.iota {dimensions = array<i32: 1>} : vector<1x8xi32>
    %19 = vector.broadcast %17 : i32 to vector<1x8xi32>
    %20 = arith.cmpi eq, %18, %19 : vector<1x8xi32>
    %21 = arith.extui %20 : vector<1x8xi1> to vector<1x8xi32>
    %c0_3 = arith.constant 0 : index
    %c0_4 = arith.constant 0 : index
    %22 = vector.load %arg2[%c0_3, %c0_4] : memref<1x8xi32, #tpu.memory_space<vmem>>, vector<1x8xi32>
    tpu.vector_store %arg2[%c0_3, %c0_4], %21 {strides = array<i32>} : memref<1x8xi32, #tpu.memory_space<vmem>>, vector<1x8xi32>,
    return
  }
  func.func @transform_0(%arg0: i32) -> (i32, i32) {
    %c0_i32 = arith.constant 0 : i32
    %c0_i32_0 = arith.constant 0 : i32
    %c0_i32_1 = arith.constant 0 : i32
    return %c0_i32, %c0_i32_0 : i32, i32
  }
  func.func @transform_1(%arg0: i32) -> (i32, i32) {
    %c0_i32 = arith.constant 0 : i32
    %c0_i32_0 = arith.constant 0 : i32
    %c0_i32_1 = arith.constant 0 : i32
    return %c0_i32, %c0_i32_0 : i32, i32
  }
}

</mosaic_0001>

<bundles_post_ra>
// kernel: tpu_custom_call.1
= control target key start
LH: loop header
LB: loop body
LE: loop exit
PB: predicated region body
PF: predicated region fallthrough
CT: control target
= control target key end

     0   :  { %6 = vsyncpa [#allocation3], 0  ;;  %s159_s0 = inlined_call_operand.hbm [shape: f32[1,8], index: 0, kind: input, shape index: {}]   ;;  %s160_s1 = inlined_call_operand.hbm [shape: s32[1,8], index: 1, kind: output, shape index: {}]  }
   0x1   :  { %7 = vsyncpa [#allocation4], 0  ;;  %s137_s6 = smov [#allocation2]  }
   0x2   :  { %s14_s7 = sshll.u32 %s137_s6, 4  ;;  %s15_s7 = int_to_ptr.vmem [resolvable:$true] %s14_s7 }
   0x3   :  { %s101_s8 = scalar_lea.vmem %s15_s7, 16  ;;  %s105_s9 = scalar_lea.vmem %s15_s7, 32 }
   0x4   :  { %p102_p0 = scmp.ne.s32.totalorder %s15_s7, %s101_s8  ;;  %p106_p1 = scmp.lt.s32.totalorder %s15_s7, %s15_s7 }
   0x5   :  { %p107_p2 = scmp.lt.s32.totalorder %s105_s9, %s101_s8 }
   0x7   :  { %p108_p3 = por %p107_p2, %p106_p1 }
   0x9   :  { %p109_p4 = pnand %p108_p3, %p102_p0 }
   0xb   :  { %112 = shalt.err (!%p109_p4)
}
   0xc   :  { %17 = dma.hbm_to_vmem [thread:$0]  %s159_s0, 16, %s15_s7, [#allocation3]  }
   0xd   :  { %133 = dma.done.wait [#allocation3], 16  }
   0xe   :  { %134 = vsyncadd [#allocation3], 4294967280  ;;  %vm22_vm0 = vcmask 57344   ;;  %v21_v0 = vld [vmem:[#allocation2] sm:$0x1]  ;;  %v33_v9 = vlaneseq  ;;  %s138_s12 = smov [#allocation5]  }
   0xf   :  { %v23_v1 = vsel %vm22_vm0, %v21_v0, -inf  ;;  %s77_s13 = sshll.u32 %s138_s12, 4  ;;  %v139_v35 = vmov 0   ;;  %s78_s13 = int_to_ptr.vmem [resolvable:$true] %s77_s13 }
  0x10   :  { %24 = vmax.xlane.f32.xlu0 %v23_v1  ;;  %v34_v10 = vshrl.u32 %v33_v9, 7  ;;  %v36_v11 = vand.u32 127, %v33_v9  ;;  %s113_s15 = scalar_lea.vmem %s78_s13, 16  ;;  %s117_s16 = scalar_lea.vmem %s78_s13, 32 }
  0x11   :  { %p114_p5 = scmp.ne.s32.totalorder %s78_s13, %s113_s15  ;;  %p118_p6 = scmp.lt.s32.totalorder %s78_s13, %s78_s13 }
  0x12   :  { %v37_v12 = vmul.u32 8, %v34_v10  ;;  %p119_p7 = scmp.lt.s32.totalorder %s117_s16, %s113_s15 }
  0x14   :  { %v38_v13 = vadd.s32 %v37_v12, %v36_v11  ;;  %p120_p8 = por %p119_p7, %p118_p6 }
  0x16   :  { %p121_p9 = pnand %p120_p8, %p114_p5 }
  0x99   :  { %v25_v2 = vpop.xlane.xlu0 %24 }
  0x9a   :  { %v26_v3 = vrot.slane %v25_v2, 4 }
  0x9c   :  { %v27_v4 = vmax.f32 %v25_v2, %v26_v3 }
  0x9e   :  { %v28_v5 = vrot.slane %v27_v4, 2 }
  0xa0   :  { %v29_v6 = vmax.f32 %v27_v4, %v28_v5 }
  0xa2   :  { %v30_v7 = vrot.slane %v29_v6, 1 }
  0xa4   :  { %v31_v8 = vmax.f32 %v29_v6, %v30_v7 }
  0xa6   :  { %86 = vpush %v31_v8 }
  0xd7   :  { %s87_s0 = spop %86 }
  0xd8   :  { %v39_v14 = vstv %s87_s0 }
  0xd9   :  { %vm40_vm1 = vcmp.eq.f32.partialorder %v21_v0, %v39_v14 }
  0xda   :  { %v41_v15 = vsel %vm40_vm1, %v38_v13, 8 }
  0xdb   :  { %v42_v16 = vsel %vm22_vm0, %v41_v15, 2147483647 }
  0xdc   :  { %v44_v17 = vshra.s32 %v42_v16, 16  ;;  %v43_v19 = vand.u32 65535, %v42_v16 }
  0xde   :  { %v46_v18 = vcvt.s32.f32 %v44_v17  ;;  %v45_v21 = vcvt.s32.f32 %v43_v19 }
  0xe0   :  { %47 = vmin.xlane.f32.xlu0 %v46_v18 }
 0x169   :  { %v48_v20 = vpop.xlane.xlu0 %47 }
 0x16a   :  { %vm49_vm2 = vcmp.eq.f32.partialorder %v46_v18, %v48_v20  ;;  %v54_v23 = vcvt.f32.s32 %v48_v20 }
 0x16b   :  { %v50_v22 = vsel %vm49_vm2, %v45_v21, inf }
 0x16c   :  { %51 = vmin.xlane.f32.xlu1 %v50_v22  ;;  %v55_v25 = vshll.u32 %v54_v23, 16 }
 0x1f5   :  { %v52_v24 = vpop.xlane.xlu1 %51 }
 0x1f6   :  { %v53_v26 = vcvt.f32.s32 %v52_v24 }
 0x1f8   :  { %v56_v27 = vadd.s32 %v55_v25, %v53_v26 }
 0x1fa   :  { %v57_v28 = vrot.slane %v56_v27, 4 }
 0x1fc   :  { %vm58_vm3 = vcmp.lt.s32.totalorder %v56_v27, %v57_v28 }
 0x1fd   :  { %v59_v29 = vsel %vm58_vm3, %v56_v27, %v57_v28 }
 0x1fe   :  { %v60_v30 = vrot.slane %v59_v29, 2 }
 0x200   :  { %vm61_vm4 = vcmp.lt.s32.totalorder %v59_v29, %v60_v30 }
 0x201   :  { %v62_v31 = vsel %vm61_vm4, %v59_v29, %v60_v30 }
 0x202   :  { %v63_v32 = vrot.slane %v62_v31, 1 }
 0x204   :  { %vm64_vm5 = vcmp.lt.s32.totalorder %v62_v31, %v63_v32 }
 0x205   :  { %v65_v33 = vsel %vm64_vm5, %v62_v31, %v63_v32 }
 0x206   :  { %88 = vpush %v65_v33 }
 0x237   :  { %s89_s14 = spop %88 }
 0x238   :  { %v67_v34 = vstv %s89_s14 }
 0x239   :  { %vm68_vm6 = vcmp.eq.s32.totalorder %v36_v11, %v67_v34 }
 0x23a   :  { %v69_v36 = vsel %vm68_vm6, 1, %v139_v35 }
 0x23b   :  { %70 = vst.msk [vmem:[#allocation5] sm:$0x1] %vm22_vm0, %v69_v36 }
 0x23c   :  { %124 = shalt.err (!%p121_p9)
}
 0x23d   :  { %80 = dma.vmem_to_hbm [thread:$0]  %s78_s13, 16, %s160_s1, [#allocation4]  }
 0x23e   :  { %135 = dma.done.wait [#allocation4], 16  }
 0x23f   :  { %136 = vsyncadd [#allocation4], 4294967280 }
 0x240   :  { %84 = vsyncpa [#allocation3], 1 }
 0x241   :  { %85 = vsyncpa [#allocation4], 1 }

</bundles_post_ra>
